<compile_context>
chip_gen: v7x
topology: tpu7x:2x2x1
jax: 0.10.0
libtpu: 0.0.40
codegen_flags: <defaults>
</compile_context>

<pallas_src>
import functools

import jax
import jax.numpy as jnp
from jax.experimental import pallas as pl
from jax.experimental.pallas import tpu as pltpu


def _proj_kernel(x_ref, w_ref, b_ref, o_ref):
    # x_ref: (cin, BL)  w_ref: (cout, cin)  b_ref: (cout, 1)  o_ref: (cout, BL)
    acc = jnp.dot(w_ref[...], x_ref[...], preferred_element_type=jnp.float32)
    o_ref[...] = (acc + b_ref[...]).astype(o_ref.dtype)


def _pick_block_lanes(total_lanes, cin, cout, itemsize,
                      target_lanes=2048, stream_budget_bytes=8 * 1024 * 1024):
    """Lane-tile size: large enough to amortize per-step overhead, small enough
    that double-buffered (in + out) blocks fit a conservative VMEM budget on
    every TPU generation (v7x has only 64 MiB/TC)."""
    cap = stream_budget_bytes // (2 * itemsize * (cin + cout))
    cap = max(128, (cap // 128) * 128)
    tile = min(target_lanes, cap)
    if total_lanes <= tile:
        return total_lanes            # one block == full dim (always legal)
    return max(128, (tile // 128) * 128)


@functools.partial(
    jax.jit,
    static_argnames=("stride", "eps", "target_lanes", "stream_dtype"))
def projection_map(x, weight, bias, gamma, beta, running_mean, running_var,
                   *, stride=2, eps=1e-5, target_lanes=2048, stream_dtype=None):
    """Forward of ProjectionMap (1x1 conv, stride s, + eval-mode BatchNorm).

    x: (N, Cin, H, W) NCHW.  weight: (Cout, Cin, 1, 1).  Returns NCHW.
    """
    n, cin, h, w = x.shape
    cout = weight.shape[0]
    assert weight.shape == (cout, cin, 1, 1)

    # ---- fold eval-mode BN + conv bias into effective weight / bias --------
    inv_std = jax.lax.rsqrt(running_var.astype(jnp.float32) + eps)
    scale = gamma.astype(jnp.float32) * inv_std                      # (cout,)
    w_eff = weight.reshape(cout, cin).astype(jnp.float32) * scale[:, None]
    b_eff = ((bias.astype(jnp.float32) - running_mean.astype(jnp.float32)) * scale
             + beta.astype(jnp.float32)).reshape(cout, 1)
    if stream_dtype is not None:
        w_eff = w_eff.astype(stream_dtype)

    # ---- stride-s subsample (single fused strided copy under jit) ----------
    x_sub = x[:, :, ::stride, ::stride]                 # (n, cin, ho, wo)
    ho, wo = x_sub.shape[2], x_sub.shape[3]
    l = ho * wo
    out_dtype = x.dtype
    itemsize = jnp.dtype(stream_dtype if stream_dtype is not None else x.dtype).itemsize

    compiler_params = pltpu.CompilerParams(
        dimension_semantics=("parallel",),
        vmem_limit_bytes=32 * 1024 * 1024)

    # ---- small feature maps: pack batch along lanes (lane-dense stores) ----
    if l < 256:
        nl = n * l
        x_flat = jnp.transpose(x_sub, (1, 0, 2, 3)).reshape(cin, nl)
        if stream_dtype is not None:
            x_flat = x_flat.astype(stream_dtype)
        bl = _pick_block_lanes(nl, cin, cout, itemsize, target_lanes)
        grid = (pl.cdiv(nl, bl),)
        out_flat = pl.pallas_call(
            _proj_kernel,
            out_shape=jax.ShapeDtypeStruct((cout, nl), out_dtype),
            grid_spec=pltpu.PrefetchScalarGridSpec(
                num_scalar_prefetch=0,
                grid=grid,
                in_specs=[
                    pl.BlockSpec((cin, bl), lambda g: (0, g)),
                    pl.BlockSpec((cout, cin), lambda g: (0, 0)),
                    pl.BlockSpec((cout, 1), lambda g: (0, 0)),
                ],
                out_specs=pl.BlockSpec((cout, bl), lambda g: (0, g)),
            ),
            compiler_params=compiler_params,
        )(x_flat, w_eff, b_eff)
        return out_flat.reshape(cout, n, ho, wo).transpose(1, 0, 2, 3)

    # ---- large feature maps: per-image layout, no pad / no trim ------------
    x_flat = x_sub.reshape(n, cin, l)
    if stream_dtype is not None:
        x_flat = x_flat.astype(stream_dtype)
    bl = _pick_block_lanes(l, cin, cout, itemsize, target_lanes)
    num_bl = pl.cdiv(l, bl)
    grid = (n * num_bl,)                 # single flattened axis (megacore-safe)
    out = pl.pallas_call(
        _proj_kernel,
        out_shape=jax.ShapeDtypeStruct((n, cout, l), out_dtype),
        grid_spec=pltpu.PrefetchScalarGridSpec(
            num_scalar_prefetch=0,
            grid=grid,
            in_specs=[
                pl.BlockSpec((pl.Squeezed(), cin, bl),
                             lambda g: (g // num_bl, 0, g % num_bl)),
                pl.BlockSpec((cout, cin), lambda g: (0, 0)),
                pl.BlockSpec((cout, 1), lambda g: (0, 0)),
            ],
            out_specs=pl.BlockSpec((pl.Squeezed(), cout, bl),
                                   lambda g: (g // num_bl, 0, g % num_bl)),
        ),
        compiler_params=compiler_params,
    )(x_flat, w_eff, b_eff)
    return out.reshape(n, cout, ho, wo)


if __name__ == "__main__":
    key = jax.random.PRNGKey(0)
    k1, k2, k3, k4, k5, k6, k7 = jax.random.split(key, 7)

    n, cin, cout, h, w, stride = 2, 4, 8, 16, 16, 2
    eps = 1e-5

    x = jax.random.normal(k1, (n, cin, h, w), dtype=jnp.float32)
    weight = 0.1 * jax.random.normal(k2, (cout, cin, 1, 1), dtype=jnp.float32)
    bias = 0.1 * jax.random.normal(k3, (cout,), dtype=jnp.float32)
    gamma = 1.0 + 0.1 * jax.random.normal(k4, (cout,), dtype=jnp.float32)
    beta = 0.1 * jax.random.normal(k5, (cout,), dtype=jnp.float32)
    running_mean = 0.1 * jax.random.normal(k6, (cout,), dtype=jnp.float32)
    running_var = jnp.abs(jax.random.normal(k7, (cout,), dtype=jnp.float32)) + 0.5

    y = projection_map(x, weight, bias, gamma, beta, running_mean, running_var,
                       stride=stride, eps=eps)
    y = jax.block_until_ready(y)

    # Pure-JAX reference of the PyTorch forward (eval-mode BatchNorm).
    x_sub = x[:, :, ::stride, ::stride]
    conv = jnp.einsum('oc,nchw->nohw', weight.reshape(cout, cin), x_sub) \
           + bias[None, :, None, None]
    ref = gamma[None, :, None, None] * (conv - running_mean[None, :, None, None]) \
          / jnp.sqrt(running_var + eps)[None, :, None, None] \
          + beta[None, :, None, None]

    assert y.shape == ref.shape, (y.shape, ref.shape)
    assert y.dtype == ref.dtype, (y.dtype, ref.dtype)
    assert jnp.allclose(y, ref, rtol=1e-3, atol=1e-3), \
        f"max abs err {jnp.max(jnp.abs(y - ref))}"

    print("KERNEL_OK")
</pallas_src>

<mosaic_0001>
module attributes {stable_mosaic.version = 11 : i64} {
  func.func @_proj_kernel(%arg0: i32, %arg1: memref<4x128xf32, #tpu.memory_space<vmem>>, %arg2: memref<8x4xf32, #tpu.memory_space<vmem>>, %arg3: memref<8x1xf32, #tpu.memory_space<vmem>>, %arg4: memref<8x128xf32, #tpu.memory_space<vmem>>) attributes {dimension_semantics = [#tpu.dimension_semantics<parallel>], iteration_bounds = array<i64: 1>, scalar_prefetch = 0 : i64, scratch_operands = 0 : i64, tpu.core_type = #tpu.core_type<tc>, window_params = [{transform_indices = @transform_0, window_bounds = array<i64: 4, 128>}, {pipeline_mode = #tpu.pipeline_mode<synchronous>, transform_indices = @transform_1, window_bounds = array<i64: 8, 4>}, {pipeline_mode = #tpu.pipeline_mode<synchronous>, transform_indices = @transform_2, window_bounds = array<i64: 8, 1>}, {transform_indices = @transform_3, window_bounds = array<i64: 8, 128>}]} {
    %c0 = arith.constant 0 : index
    %c0_0 = arith.constant 0 : index
    %0 = vector.load %arg2[%c0, %c0_0] : memref<8x4xf32, #tpu.memory_space<vmem>>, vector<8x4xf32>
    %c0_1 = arith.constant 0 : index
    %c0_2 = arith.constant 0 : index
    %1 = vector.load %arg1[%c0_1, %c0_2] : memref<4x128xf32, #tpu.memory_space<vmem>>, vector<4x128xf32>
    %cst = arith.constant dense<0.000000e+00> : vector<8x128xf32>
    %2 = tpu.matmul %0, %1, %cst {dimension_numbers = #tpu.dot_dimension_numbers<[1], [0], [0], [1], [0, 0, 1, 1], [], []>} : vector<8x4xf32>, vector<4x128xf32>, vector<8x128xf32> -> vector<8x128xf32>
    %c0_3 = arith.constant 0 : index
    %c0_4 = arith.constant 0 : index
    %3 = vector.load %arg3[%c0_3, %c0_4] : memref<8x1xf32, #tpu.memory_space<vmem>>, vector<8x1xf32>
    %4 = vector.broadcast %3 : vector<8x1xf32> to vector<8x128xf32>
    %5 = arith.addf %2, %4 : vector<8x128xf32>
    %c0_5 = arith.constant 0 : index
    %c0_6 = arith.constant 0 : index
    %6 = vector.load %arg4[%c0_5, %c0_6] : memref<8x128xf32, #tpu.memory_space<vmem>>, vector<8x128xf32>
    tpu.vector_store %arg4[%c0_5, %c0_6], %5 {strides = array<i32>} : memref<8x128xf32, #tpu.memory_space<vmem>>, vector<8x128xf32>,
    return
  }
  func.func @transform_0(%arg0: i32) -> (i32, i32) {
    %c0_i32 = arith.constant 0 : i32
    %c0_i32_0 = arith.constant 0 : i32
    return %c0_i32, %arg0 : i32, i32
  }
  func.func @transform_1(%arg0: i32) -> (i32, i32) {
    %c0_i32 = arith.constant 0 : i32
    %c0_i32_0 = arith.constant 0 : i32
    %c0_i32_1 = arith.constant 0 : i32
    return %c0_i32, %c0_i32_0 : i32, i32
  }
  func.func @transform_2(%arg0: i32) -> (i32, i32) {
    %c0_i32 = arith.constant 0 : i32
    %c0_i32_0 = arith.constant 0 : i32
    %c0_i32_1 = arith.constant 0 : i32
    return %c0_i32, %c0_i32_0 : i32, i32
  }
  func.func @transform_3(%arg0: i32) -> (i32, i32) {
    %c0_i32 = arith.constant 0 : i32
    %c0_i32_0 = arith.constant 0 : i32
    return %c0_i32, %arg0 : i32, i32
  }
}

</mosaic_0001>

<bundles_post_ra>
// kernel: projection_map.1
= control target key start
LH: loop header
LB: loop body
LE: loop exit
PB: predicated region body
PF: predicated region fallthrough
CT: control target
= control target key end

     0   :  { %vm26_vm0 = vcmask 1043456   ;;  %vm22_vm1 = vcmask 31744   ;;  %v118_v0 = vmov 0.0   ;;  %vm119_vm2 = vmmov 0   ;;  %s153_s0 = inlined_call_operand.vmem [shape: f32[4,128], index: 0, kind: input, shape index: {}]   ;;  %s154_s1 = inlined_call_operand.vmem [shape: f32[8,4], index: 1, kind: input, shape index: {}]   ;;  %s155_s2 = inlined_call_operand.vmem [shape: f32[8,1], index: 2, kind: input, shape index: {}]   ;;  %s156_s3 = inlined_call_operand.vmem [shape: f32[8,128], index: 3, kind: output, shape index: {}]  }
   0x1   :  { %109 = vmatprep.subr.mxu0 %v118_v0  ;;  %v15_v1 = vld [vmem:[%s153_s0] sm:$0xf]  ;;  %111 = vmatprep.mubr.msk.f32.mxu0 %vm119_vm2, %v118_v0  ;;  %v120_v4 = vmov 0  }
   0x2   :  { %v14_v2 = vld [vmem:[%s154_s1] sm:$0xff]  ;;  %110 = vmatpush3.msk.msra.mxu0 %vm26_vm0, %v15_v1  ;;  %117 = vset.pattern.permute.xlu0 %v120_v4 }
   0x3   :  { %v16_v3 = vld [vmem:[%s155_s2] sm:$0xff]  ;;  %112 = vmatmul.mubr.msk.f32.vlgmr.msra.gmra.mrb[0].mxu0 %vm22_vm1, %v14_v2 }
   0x4   :  { %19 = vperm.xlu0 %117, %v16_v3  }
  0x83   :  { %v20_v5 = vpop.permute.xlu0 %19 }
  0xd6   :  { %v96_v6 = vpop.f32.mrb[0].mxu0 }
  0xd7   :  { %v97_v7 = vadd.f32 %v96_v6, %v20_v5  ;;  %v113_v8 = vpop.f32.mrb[1].mxu0 }
  0xd9   :  { %100 = vst [vmem:[%s156_s3] sm:$0xff] %v97_v7 }

</bundles_post_ra>
